<compile_context>
chip_gen: v6e
topology: v6e:2x2x1
jax: 0.10.0
libtpu: 0.0.40
codegen_flags: <defaults>
</compile_context>

<pallas_src>
import jax
import jax.numpy as jnp
from jax.experimental import pallas as pl
from jax.experimental.pallas import tpu as pltpu

_LANES = 128


def _oscigrad_kernel(a_ref, y_ref, o_ref):
    """One (block_rows, 128) lane-dense tile.

    Lane 2j holds x_j, lane 2j+1 holds p_j of consecutive states.  Per pair:
      out_x = A00*x + A01*p ,  out_p = A10*x + A11*p
    """
    # Compute in f32 (safe on v5e which has no bf16 VALU); for bf16 inputs on
    # v6e/v7x the cast could be skipped to halve vreg pressure.
    y = y_ref[...].astype(jnp.float32)

    lane = jax.lax.broadcasted_iota(jnp.int32, y.shape, dimension=1)
    is_even = (lane % 2) == 0

    # Partner value of each lane within its (x, p) pair (XLU rolls, jnp.roll
    # semantics; 127 == -1 mod 128 keeps the shift non-negative):
    #   even lane i -> lane i+1 ,  odd lane i -> lane i-1
    partner = jnp.where(
        is_even,
        pltpu.roll(y, shift=127, axis=1),
        pltpu.roll(y, shift=1, axis=1),
    )

    c_same = jnp.where(is_even, a_ref[0], a_ref[3])  # A00 on x-slots, A11 on p-slots
    c_swap = jnp.where(is_even, a_ref[1], a_ref[2])  # A01 on x-slots, A10 on p-slots

    o_ref[...] = (y * c_same + partner * c_swap).astype(o_ref.dtype)


def oscigrad_forward(t, y, A, *, block_rows=2048):
    """Pallas implementation of oscigradH.forward(t, y) = y @ A.T.

    Args:
      t: time scalar (unused, kept for API parity with the PyTorch module).
      y: [batch, 2] state array.
      A: [2, 2] system matrix.
      block_rows: rows of the lane-dense [rows, 128] tile per grid step
        (multiple of 8).
    Returns:
      [batch, 2] array, dtype of y.
    """
    del t  # unused, exactly like the PyTorch module
    if block_rows % 8 != 0:
        raise ValueError("block_rows must be a multiple of 8")
    B, D = y.shape
    assert D == 2 and A.shape == (2, 2)

    # NOTE: for tiny batches an XLA-fused elementwise expression is faster than
    # paying pallas_call launch overhead; callers may dispatch on B if needed.

    coef = jnp.asarray(A, jnp.float32).reshape(4)  # [A00, A01, A10, A11] in SMEM

    # Lane-dense retile: flatten the contiguous [B, 2] array into rows of 128
    # lanes, padding the flat tail so the grid covers whole (tb, 128) tiles.
    # Pairs never straddle a row (2 divides 128), and padded lanes only produce
    # garbage that is sliced off afterwards.
    n = B * D
    rows = pl.cdiv(n, _LANES)
    tb = min(block_rows, 8 * pl.cdiv(rows, 8))
    padded_rows = tb * pl.cdiv(rows, tb)
    n_padded = padded_rows * _LANES

    y_flat = jnp.ravel(y)
    if n_padded != n:
        y_flat = jnp.pad(y_flat, (0, n_padded - n))
    y_tiles = y_flat.reshape(padded_rows, _LANES)

    out_tiles = pl.pallas_call(
        _oscigrad_kernel,
        out_shape=jax.ShapeDtypeStruct((padded_rows, _LANES), y.dtype),
        grid_spec=pltpu.PrefetchScalarGridSpec(
            num_scalar_prefetch=0,
            grid=(padded_rows // tb,),
            in_specs=[
                # 4 scalars of A live in SMEM (no padded VMEM tile / DMA stream).
                pl.BlockSpec(memory_space=pltpu.MemorySpace.SMEM),
                pl.BlockSpec((tb, _LANES), lambda i: (i, 0)),
            ],
            out_specs=pl.BlockSpec((tb, _LANES), lambda i: (i, 0)),
        ),
        compiler_params=pltpu.CompilerParams(
            dimension_semantics=("parallel",),
        ),
    )(coef, y_tiles)

    out_flat = out_tiles.reshape(-1)
    if n_padded != n:
        out_flat = out_flat[:n]
    return out_flat.reshape(B, D)


def make_A(k, m):
    """Deterministic parameter construction, matching oscigradH.__init__."""
    A = jnp.zeros((2, 2), jnp.float32)
    A = A.at[0, 1].set(1.0 / m)
    A = A.at[1, 0].set(-k)
    return A


if __name__ == "__main__":
    k_const, m_const = 2.0, 0.5
    A = make_A(k_const, m_const)
    t = jnp.float32(0.0)

    key1, key2 = jax.random.split(jax.random.PRNGKey(0))

    # Case 1: even batch, small block_rows so the grid has multiple pipelined
    # steps (4096 states -> 64 lane-dense rows -> grid of 4 tiles of 16 rows).
    y1 = jax.random.normal(key1, (4096, 2), dtype=jnp.float32)
    out1 = jax.block_until_ready(oscigrad_forward(t, y1, A, block_rows=16))
    ref1 = y1 @ jnp.asarray(A).T
    assert out1.shape == y1.shape and out1.dtype == y1.dtype
    assert jnp.allclose(out1, ref1, atol=1e-5, rtol=1e-5)

    # Case 2: ragged batch (not a multiple of 64) exercising the pad/slice path.
    y2 = jax.random.normal(key2, (100, 2), dtype=jnp.float32)
    out2 = jax.block_until_ready(oscigrad_forward(t, y2, A))
    ref2 = y2 @ jnp.asarray(A).T
    assert out2.shape == y2.shape
    assert jnp.allclose(out2, ref2, atol=1e-5, rtol=1e-5)

    print("KERNEL_OK")
</pallas_src>

<mosaic_0001>
module attributes {stable_mosaic.version = 11 : i64} {
  func.func @_oscigrad_kernel(%arg0: i32, %arg1: memref<4xf32, #tpu.memory_space<smem>>, %arg2: memref<16x128xf32, #tpu.memory_space<vmem>>, %arg3: memref<16x128xf32, #tpu.memory_space<vmem>>) attributes {dimension_semantics = [#tpu.dimension_semantics<parallel>], iteration_bounds = array<i64: 4>, scalar_prefetch = 0 : i64, scratch_operands = 0 : i64, tpu.core_type = #tpu.core_type<tc>, window_params = [{transform_indices = @transform_0, window_bounds = array<i64: 4>}, {transform_indices = @transform_1, window_bounds = array<i64: 16, 128>}, {transform_indices = @transform_2, window_bounds = array<i64: 16, 128>}]} {
    %c0 = arith.constant 0 : index
    %c0_0 = arith.constant 0 : index
    %0 = vector.load %arg2[%c0, %c0_0] : memref<16x128xf32, #tpu.memory_space<vmem>>, vector<16x128xf32>
    %1 = tpu.iota {dimensions = array<i32: 1>} : vector<16x128xi32>
    %c2_i32 = arith.constant 2 : i32
    %c0_i32 = arith.constant 0 : i32
    %2 = arith.cmpi eq, %c2_i32, %c0_i32 : i32
    %c1_i32 = arith.constant 1 : i32
    %3 = arith.select %2, %c1_i32, %c2_i32 : i32
    %4 = vector.broadcast %3 : i32 to vector<16x128xi32>
    %5 = arith.remsi %1, %4 : vector<16x128xi32>
    %c0_i32_1 = arith.constant 0 : i32
    %6 = vector.broadcast %c0_i32_1 : i32 to vector<16x128xi32>
    %7 = arith.cmpi ne, %5, %6 : vector<16x128xi32>
    %c0_i32_2 = arith.constant 0 : i32
    %8 = vector.broadcast %c0_i32_2 : i32 to vector<16x128xi32>
    %9 = arith.cmpi slt, %5, %8 : vector<16x128xi32>
    %c0_i32_3 = arith.constant 0 : i32
    %10 = arith.cmpi slt, %3, %c0_i32_3 : i32
    %11 = vector.broadcast %10 : i1 to vector<16x128xi1>
    %12 = vector.broadcast %11 : vector<16x128xi1> to vector<16x128xi1>
    %13 = arith.xori %9, %12 : vector<16x128xi1>
    %14 = arith.andi %13, %7 : vector<16x128xi1>
    %15 = vector.broadcast %3 : i32 to vector<16x128xi32>
    %16 = arith.addi %5, %15 : vector<16x128xi32>
    %17 = arith.select %14, %16, %5 : vector<16x128xi1>, vector<16x128xi32>
    %c0_i32_4 = arith.constant 0 : i32
    %18 = vector.broadcast %c0_i32_4 : i32 to vector<16x128xi32>
    %19 = arith.cmpi eq, %17, %18 : vector<16x128xi32>
    %c127_i32 = arith.constant 127 : i32
    %20 = tpu.dynamic_rotate %0 by %c127_i32 dim 1 : vector<16x128xf32>, i32 -> vector<16x128xf32>
    %c1_i32_5 = arith.constant 1 : i32
    %21 = tpu.dynamic_rotate %0 by %c1_i32_5 dim 1 : vector<16x128xf32>, i32 -> vector<16x128xf32>
    %22 = arith.select %19, %20, %21 : vector<16x128xi1>, vector<16x128xf32>
    %c0_6 = arith.constant 0 : index
    %23 = memref.load %arg1[%c0_6] : memref<4xf32, #tpu.memory_space<smem>>
    %c3 = arith.constant 3 : index
    %24 = memref.load %arg1[%c3] : memref<4xf32, #tpu.memory_space<smem>>
    %25 = vector.broadcast %23 : f32 to vector<16x128xf32>
    %26 = vector.broadcast %24 : f32 to vector<16x128xf32>
    %27 = arith.select %19, %25, %26 : vector<16x128xi1>, vector<16x128xf32>
    %c1 = arith.constant 1 : index
    %28 = memref.load %arg1[%c1] : memref<4xf32, #tpu.memory_space<smem>>
    %c2 = arith.constant 2 : index
    %29 = memref.load %arg1[%c2] : memref<4xf32, #tpu.memory_space<smem>>
    %30 = vector.broadcast %28 : f32 to vector<16x128xf32>
    %31 = vector.broadcast %29 : f32 to vector<16x128xf32>
    %32 = arith.select %19, %30, %31 : vector<16x128xi1>, vector<16x128xf32>
    %33 = arith.mulf %0, %27 : vector<16x128xf32>
    %34 = arith.mulf %22, %32 : vector<16x128xf32>
    %35 = arith.addf %33, %34 : vector<16x128xf32>
    %c0_7 = arith.constant 0 : index
    %c0_8 = arith.constant 0 : index
    %36 = vector.load %arg3[%c0_7, %c0_8] : memref<16x128xf32, #tpu.memory_space<vmem>>, vector<16x128xf32>
    tpu.vector_store %arg3[%c0_7, %c0_8], %35 {strides = array<i32>} : memref<16x128xf32, #tpu.memory_space<vmem>>, vector<16x128xf32>,
    return
  }
  func.func @transform_0(%arg0: i32) -> i32 {
    %c0_i32 = arith.constant 0 : i32
    %c0_i32_0 = arith.constant 0 : i32
    return %c0_i32 : i32
  }
  func.func @transform_1(%arg0: i32) -> (i32, i32) {
    %c0_i32 = arith.constant 0 : i32
    %c0_i32_0 = arith.constant 0 : i32
    return %arg0, %c0_i32 : i32, i32
  }
  func.func @transform_2(%arg0: i32) -> (i32, i32) {
    %c0_i32 = arith.constant 0 : i32
    %c0_i32_0 = arith.constant 0 : i32
    return %arg0, %c0_i32 : i32, i32
  }
}

</mosaic_0001>

<bundles_post_ra>
// kernel: tpu_custom_call.1
= control target key start
LH: loop header
LB: loop body
LE: loop exit
PB: predicated region body
PF: predicated region fallthrough
CT: control target
= control target key end

     0   :  { %7 = vsyncpa [#allocation5], 0  ;;  %s724_s0 = inlined_call_operand.hbm [shape: f32[4], index: 0, kind: input, shape index: {}]   ;;  %s725_s1 = inlined_call_operand.hbm [shape: f32[64,128], index: 1, kind: input, shape index: {}]   ;;  %s726_s2 = inlined_call_operand.hbm [shape: f32[64,128], index: 2, kind: output, shape index: {}]  }
   0x1   :  { %8 = vsyncpa [#allocation3], 0 }
   0x2   :  { %10 = vsyncpa [#allocation3 + $0x1], 0 }
   0x3   :  { %11 = vsyncpa [#allocation4], 0 }
   0x4   :  { %13 = vsyncpa [#allocation4 + $0x1], 0  ;;  %s537_s9 = smov 0   ;;  %s539_s10 = smov 0  }
   0x5   :  { %s541_s11 = smov 0   ;;  %s543_s12 = smov 0  }
   0x6 LB: > { %s558_s13 = sadd.s32 4294967295, %s511_s12   ;;  %s320_s14 = sadd.s32 4294967294, %s511_s12   ;;  %s511_s12 = sphi %s543_s12, %s748_s12   ;;  %s507_s11 = sphi %s541_s11, %s747_s11   ;;  %s503_s10 = sphi %s539_s10, %s746_s10   ;;  %s499_s9 = sphi %s537_s9, %s745_s9  }
   0x7   : > { %s562_s15 = sadd.s32 1, %s511_s12   ;;  %s47_s16 = sadd.s32 1, %s507_s11 }
   0x8   : > { %s44_s17 = ssub.s32 %s511_s12, %s562_s15  ;;  %p54_p0 = scmp.ne.s32.totalorder %s507_s11, %s503_s10 }
   0x9   : > { %p45_p1 = scmp.eq.s32.totalorder %s44_s17, 0  ;;  %p55_p2 = scmp.eq.s32.totalorder %s511_s12, 0 }
   0xa   : > { %p60_p3 = scmp.ne.s32.totalorder %s503_s10, %s499_s9  ;;  %p728_p4 = scmp.eq.s32.totalorder %s558_s13, 0 }
   0xb   : > { %s574_s18 = scalar_select %p45_p1, %s507_s11, %s47_s16  }
   0xc   : > { %p576_p5 = por %p55_p2, %p54_p0  ;;  %p582_p6 = por %p728_p4, %p60_p3 }
   0xd   : > { %p84_p7 = scmp.eq.s32.totalorder %s558_s13, 3  ;;  %p90_p8 = scmp.eq.s32.totalorder %s320_s14, 3 }
   0xe   : > { %s732_s20 = scalar_select %p582_p6, 1, 0 }
   0xf   : > { %p321_p9 = scmp.ge.s32.totalorder %s511_s12, 1  ;;  %p97_p10 = scmp.lt.s32.totalorder %s511_s12, 5 }
  0x10   : > { %p589_p11 = por %p84_p7, %p54_p0  ;;  %p593_p12 = por %p90_p8, %p60_p3 }
  0x11   : > { %p597_p13 = pnand %p321_p9, %p97_p10  ;;  %p362_p2 = scmp.lt.s32.totalorder %s511_s12, 4 }
  0x12   : > { %s733_s21 = scalar_select %p589_p11, 1, 0 }
  0x13   : > { %s734_s22 = scalar_select %p593_p12, 1, 0 }
  0x14   : > { %s735_s23 = scalar_select %p597_p13, 1, 0 }
  0x15   : > { %p349_p1 = pneg %p597_p13  ;;  %s119_s24 = sand.u32 1, %s507_s11  }
  0x16   : > { %s339_s25 = sshll.u32 %s511_s12, 8  ;;  %p610_p0 = pnand %p362_p2, %p576_p5 }
  0x17   : > { %p350_p6 = pnand %p349_p1, %p728_p4  ;;  %s324_s27 = sshll.u32 %s119_s24, 4 }
  0x18   : > { %s513_s28 = smov [#allocation2]   ;;  %s620_s5 = scalar_lea.hbm %s725_s1, %s339_s25 }
  0x19   : > { %352 = dma.hbm_to_smem (!%p350_p6), %s724_s0, 16, %s513_s28, [#allocation5]  }
  0x1a   : > { %s123_s6 = scalar_lea.vmem [#allocation6], %s324_s27  ;;  %s624_s8 = scalar_lea.sflag [#allocation3], %s119_s24 }
  0x1b   : > { %s130_s7 = sshll.u32 %s123_s6, 4  ;;  %s415_s14 = scalar_lea.hbm %s620_s5, 256  ;;  %s622_s7 = int_to_ptr.vmem [resolvable:$true] %s130_s7 }
  0x1c   : > { %p416_p3 = scmp.ne.s32.totalorder %s620_s5, %s415_s14  ;;  %p417_p5 = pneg %p610_p0 }
  0x1d   : > { %s420_s19 = scalar_lea.hbm %s725_s1, 1024  ;;  %p421_p8 = scmp.lt.s32.totalorder %s620_s5, %s725_s1 }
  0x1e   : > { %p418_p7 = pnand %p417_p5, %p416_p3  ;;  %p422_p9 = scmp.lt.s32.totalorder %s420_s19, %s415_s14 }
  0x20   : > { %p419_p6 = pneg %p418_p7  ;;  %p423_p10 = por %p422_p9, %p421_p8 }
  0x22   : > { %p424_p1 = pnand %p423_p10, %p419_p6 }
  0x24   : > { %427 = shalt.err (!%p424_p1)
}
  0x25   : > { %s428_s24 = scalar_lea.vmem %s622_s7, 256  ;;  %s514_s27 = smov [#allocation6]  }
  0x26   : > { %p429_p2 = scmp.ne.s32.totalorder %s622_s7, %s428_s24  ;;  %s433_s29 = sshll.u32 %s514_s27, 4  ;;  %s434_s29 = int_to_ptr.vmem [resolvable:$false] %s433_s29 }
  0x27   : > { %s435_s30 = scalar_lea.vmem %s434_s29, 512  ;;  %p436_p7 = scmp.lt.s32.totalorder %s622_s7, %s434_s29 }
  0x28   : > { %p431_p4 = pnand %p429_p2, %p417_p5  ;;  %p437_p12 = scmp.lt.s32.totalorder %s435_s30, %s428_s24 }
  0x2a   : > { %p432_p3 = pneg %p431_p4  ;;  %p438_p11 = por %p437_p12, %p436_p7 }
  0x2c   : > { %p439_p13 = pnand %p438_p11, %p432_p3 }
  0x2e   : > { %442 = shalt.err (!%p439_p13)
}
  0x2f   : > { %s515_s3 = smov 128   ;;  %s516_s4 = smov 8  }
  0x30   : > { %356 = dma.hbm_to_vmem [thread:$0]  (!%p610_p0), %s620_s5, 256, %s622_s7, %s624_s8, %s515_s3, %s515_s3, %s516_s4  }
  0x31   : > { %p737_p5 = scmp.ne.s32.totalorder %s735_s23, 0 }
  0x32   : > { %p738_p4 = scmp.eq.s32.totalorder (!%p737_p5), %s558_s13, 0 }
  0x33   : > { %142 = sbr.rel (%p737_p5) target bundleno = 202 (0xca), region = 28 }
  0x38   : > { %486 = dma.done.wait (%p738_p4), [#allocation5], 16   ;;  %p739_p6 = pmov %p738_p4 }
  0x39   : > { %s652_s6 = sand.u32 1, %s503_s10   ;;  %p740_p11 = scmp.ne.s32.totalorder %s732_s20, 0 }
  0x3a   : > { %488 = vsyncadd (%p739_p6), [#allocation5], 4294967280  ;;  %s329_s14 = sshll.u32 %s652_s6, 4  ;;  %s149_s16 = scalar_lea.sflag [#allocation3], %s652_s6 }
  0x3b   : > { %s152_s26 = scalar_lea.vmem [#allocation6], %s329_s14 }
  0x3c   : > { %490 = dma.done.wait (%p740_p11), %s149_s16, 256  }
  0x3d   : > { %492 = vsyncadd (%p740_p11), %s149_s16, 4294967040 }
  0x3e   : > { %157 = sfence }
  0x3f   : > { %v176_v0 = vld [vmem:[%s152_s26] sm:$0xff]  ;;  %s517_s23 = smov 1   ;;  %s518_s5 = smov 127   ;;  %v177_v1 = vld [vmem:[%s152_s26 + $0x8] sm:$0xff]  ;;  %v178_v2 = vlaneseq }
  0x40   : > { %197 = vrot.lane.b32.xlu1 %v176_v0, %s517_s23  ;;  %193 = vrot.lane.b32.xlu0 %v176_v0, %s518_s5  ;;  %s203_s7 = sld [smem:[#allocation2]]  ;;  %s173_s20 = scalar_lea.vmem [#allocation7], %s329_s14 }
  0x41   : > { %v179_v3 = vand.u32 127, %v178_v2  ;;  %s331_s8 = sld [smem:[#allocation2 + $0x3]]  ;;  %s235_s25 = sshll.u32 %s173_s20, 4  ;;  %s677_s25 = int_to_ptr.vmem [resolvable:$true] %s235_s25 }
  0x42   : > { %s332_s17 = sld [smem:[#allocation2 + $0x1]]  ;;  %s340_s28 = sshll.u32 %s558_s13, 8 }
  0x43   : > { %s333_s19 = sld [smem:[#allocation2 + $0x2]]  ;;  %v184_v4 = vand.u32 1, %v179_v3  ;;  %s682_s29 = scalar_lea.hbm %s726_s2, %s340_s28 }
  0x44   : > { %199 = vrot.lane.b32.xlu1 %v177_v1, %s517_s23  ;;  %195 = vrot.lane.b32.xlu0 %v177_v1, %s518_s5  ;;  %s222_s30 = scalar_lea.sflag [#allocation4], %s652_s6  ;;  %s443_s3 = scalar_lea.vmem %s677_s25, 256 }
  0x45   : > { %vm662_vm0 = vcmp.eq.s32.totalorder %v184_v4, 0  ;;  %p444_p12 = scmp.ne.s32.totalorder %s677_s25, %s443_s3  ;;  %p743_p13 = scmp.ne.s32.totalorder %s733_s21, 0 }
  0x46   : > { %v205_v6 = vstv %s203_s7  ;;  %s519_s13 = smov [#allocation7]  }
  0x47   : > { %v206_v7 = vstv %s331_s8  ;;  %p445_p0 = pnand %p444_p12, %p743_p13  ;;  %s447_s4 = sshll.u32 %s519_s13, 4  ;;  %s448_s4 = int_to_ptr.vmem [resolvable:$false] %s447_s4 }
  0x48   : > { %v210_v8 = vstv %s332_s17  ;;  %v207_v10 = vsel %vm662_vm0, %v205_v6, %v206_v7  ;;  %s449_s14 = scalar_lea.vmem %s448_s4, 512  ;;  %p450_p9 = scmp.lt.s32.totalorder %s677_s25, %s448_s4 }
  0x49   : > { %v211_v9 = vstv %s333_s19  ;;  %v213_v13 = vmul.f32 %v207_v10, %v176_v0  ;;  %v214_v18 = vmul.f32 %v207_v10, %v177_v1  ;;  %p446_p8 = pneg %p445_p0  ;;  %p451_p10 = scmp.lt.s32.totalorder %s449_s14, %s443_s3 }
  0x4a   : > { %v212_v12 = vsel %vm662_vm0, %v210_v8, %v211_v9 }
  0x4b   : > { %p452_p1 = por %p451_p10, %p450_p9 }
  0x4d   : > { %p453_p2 = pnand %p452_p1, %p446_p8 }
  0xb2   : > { %v198_v11 = vpop.permute.xlu1 %197  ;;  %v194_v14 = vpop.permute.xlu0 %193 }
  0xb3   : > { %v201_v15 = vsel %vm662_vm0, %v194_v14, %v198_v11 }
  0xb4   : > { %v215_v16 = vmul.f32 %v212_v12, %v201_v15 }
  0xb6   : > { %v200_v17 = vpop.permute.xlu1 %199  ;;  %v217_v19 = vadd.f32 %v215_v16, %v213_v13  ;;  %v196_v20 = vpop.permute.xlu0 %195 }
  0xb7   : > { %v202_v21 = vsel %vm662_vm0, %v196_v20, %v200_v17 }
  0xb8   : > { %219 = vst [vmem:[%s173_s20] sm:$0xff] %v217_v19  ;;  %v216_v22 = vmul.f32 %v212_v12, %v202_v21 }
  0xba   : > { %v218_v23 = vadd.f32 %v216_v22, %v214_v18 }
  0xbc   : > { %220 = vst [vmem:[%s173_s20 + $0x8] sm:$0xff] %v218_v23 }
  0xbd   : > { %456 = shalt.err (!%p453_p2)
}
  0xbe   : > { %s457_s16 = scalar_lea.hbm %s682_s29, 256  ;;  %s461_s5 = scalar_lea.hbm %s726_s2, 1024 }
  0xbf   : > { %p458_p3 = scmp.ne.s32.totalorder %s682_s29, %s457_s16  ;;  %p462_p4 = scmp.lt.s32.totalorder %s682_s29, %s726_s2 }
  0xc0   : > { %p463_p6 = scmp.lt.s32.totalorder %s461_s5, %s457_s16 }
  0xc1   : > { %p459_p7 = pnand %p458_p3, %p743_p13 }
  0xc2   : > { %p464_p11 = por %p463_p6, %p462_p4 }
  0xc3   : > { %p460_p5 = pneg %p459_p7 }
  0xc5   : > { %p465_p12 = pnand %p464_p11, %p460_p5 }
  0xc7   : > { %468 = shalt.err (!%p465_p12)
}
  0xc8   : > { %s520_s17 = smov 128   ;;  %s521_s19 = smov 8  }
  0xc9   : > { %347 = dma.vmem_to_hbm [thread:$0]  (%p743_p13), %s677_s25, 256, %s682_s29, %s222_s30, %s520_s17, %s520_s17, %s521_s19  }
  0xca PF: > { %p364_p0 = scmp.ge.s32.totalorder %s511_s12, 2  ;;  %s250_s20 = sand.u32 1, %s499_s9  }
  0xcb   : > { %p744_p8 = scmp.ne.s32.totalorder %s734_s22, 0  ;;  %s251_s28 = scalar_lea.sflag [#allocation4], %s250_s20 }
  0xcd   : > { %p358_p9 = pnand %p364_p0, %p744_p8 }
  0xcf   : > { %p359_p10 = pneg %p358_p9 }
  0xd1   : > { %494 = dma.done.wait (%p359_p10), %s251_s28, 256  }
  0xd2   : > { %496 = vsyncadd (%p359_p10), %s251_s28, 4294967040  ;;  %p16_p1 = scmp.ge.s32.totalorder %s562_s15, 6   ;;  %s745_s9 = smov %s503_s10 }
  0xd3   : > { %s746_s10 = smov %s507_s11  ;;  %s747_s11 = smov %s574_s18 }
  0xd4   : > { %s748_s12 = smov %s562_s15  ;;  %18 = sbr.rel (!%p16_p1) target bundleno = 6 (0x6), region = 78 }
  0xd9   :  { %256 = vsyncpa [#allocation3], 1 }
  0xda   :  { %258 = vsyncpa [#allocation3 + $0x1], 1 }
  0xdb   :  { %259 = vsyncpa [#allocation4], 1 }
  0xdc   :  { %261 = vsyncpa [#allocation4 + $0x1], 1 }
  0xdd   :  { %262 = vsyncpa [#allocation5], 1 }
  0xde   :  { %264 = vsyncpa [#allocation5 + $0x1], 1 }

</bundles_post_ra>
